<compile_context>
chip_gen: v7x
topology: tpu7x:2x2x1
jax: 0.10.0
libtpu: 0.0.40
codegen_flags: <defaults>
</compile_context>

<pallas_src>
import functools

import jax
import jax.numpy as jnp
from jax.experimental import pallas as pl
from jax.experimental.pallas import tpu as pltpu

IN_FEATURES = 784
HIDDEN = 256
OUT_FEATURES = 1
DROPOUT_P = 0.1


def _disc_kernel(x_ref, w1_ref, b1_ref, w2_ref, b2_ref, *rest, training: bool):
    """One batch tile: Linear(784->256) -> ReLU -> Dropout -> Linear(256->1)."""
    if training:
        u_ref, o_ref = rest
    else:
        (o_ref,) = rest

    # ---- hidden = Linear(784, 256): bf16 inputs, f32 accumulation on the MXU ----
    h = jnp.dot(x_ref[...], w1_ref[...], preferred_element_type=jnp.float32)
    h = h + b1_ref[...]                     # (TB, 256) + (1, 256), f32

    # ---- ReLU (VPU) ----
    h = jnp.maximum(h, 0.0)

    # ---- Dropout(p=0.1): inverted dropout; 1/(1-p) is folded into w2 host-side ----
    if training:
        keep = u_ref[...] >= DROPOUT_P      # compare + select only
        h = jnp.where(keep, h, 0.0)

    # ---- out = Linear(256, 1) as VPU multiply + lane reduce (avoid N=1 MXU op) ----
    y = jnp.sum(h * w2_ref[...], axis=-1, keepdims=True) + b2_ref[...]
    o_ref[...] = y.astype(o_ref.dtype)


def discriminator_forward(x, params, *, key=None, training: bool = True,
                          block_b: int = 512):
    """x: (B, 784) float32 -> (B, 1) float32."""
    w1, b1, w2, b2 = params
    B = x.shape[0]
    TB = min(block_b, B)
    grid = (pl.cdiv(B, TB),)

    # bf16 MXU path for the large matmul (halves x HBM traffic too).
    x_bf = x.astype(jnp.bfloat16)
    w1_bf = w1.astype(jnp.bfloat16)

    # Second Linear as a (1, 256) row; fold the inverted-dropout scale into it.
    w2_row = w2.reshape(1, HIDDEN)
    if training:
        w2_row = w2_row * (1.0 / (1.0 - DROPOUT_P))

    resident = lambda i: (0, 0)
    in_specs = [
        pl.BlockSpec((TB, IN_FEATURES), lambda i: (i, 0)),   # x batch tile
        pl.BlockSpec((IN_FEATURES, HIDDEN), resident),       # w1 (VMEM-resident)
        pl.BlockSpec((1, HIDDEN), resident),                 # b1
        pl.BlockSpec((1, HIDDEN), resident),                 # w2 row
        pl.BlockSpec((1, OUT_FEATURES), resident),           # b2
    ]
    inputs = [x_bf, w1_bf, b1, w2_row, b2]

    if training:
        if key is None:
            key = jax.random.PRNGKey(0)
        # TODO(synk): on a real TPU these uniforms could be generated in-kernel
        # with pltpu.prng_seed(seed + pl.program_id(0)) + pltpu.prng_random_bits,
        # but those primitives have no interpret-mode lowering, so draw host-side.
        u = jax.random.uniform(key, (B, HIDDEN), jnp.float32)
        in_specs.append(pl.BlockSpec((TB, HIDDEN), lambda i: (i, 0)))
        inputs.append(u)

    return pl.pallas_call(
        functools.partial(_disc_kernel, training=training),
        out_shape=jax.ShapeDtypeStruct((B, OUT_FEATURES), jnp.float32),
        grid=grid,
        in_specs=in_specs,
        out_specs=pl.BlockSpec((TB, OUT_FEATURES), lambda i: (i, 0)),
        compiler_params=pltpu.CompilerParams(
            dimension_semantics=("parallel",)),
    )(*inputs)


def init_params(key):
    """Deterministic init matching PyTorch nn.Linear default (U(-1/sqrt(fan_in), +))."""
    k1, k2, k3, k4 = jax.random.split(key, 4)
    bound1 = 1.0 / (IN_FEATURES ** 0.5)
    bound2 = 1.0 / (HIDDEN ** 0.5)
    # Stored as (in, out): transpose of PyTorch's (out, in) weight layout.
    w1 = jax.random.uniform(k1, (IN_FEATURES, HIDDEN), jnp.float32, -bound1, bound1)
    b1 = jax.random.uniform(k2, (1, HIDDEN), jnp.float32, -bound1, bound1)
    w2 = jax.random.uniform(k3, (HIDDEN, OUT_FEATURES), jnp.float32, -bound2, bound2)
    b2 = jax.random.uniform(k4, (1, OUT_FEATURES), jnp.float32, -bound2, bound2)
    return w1, b1, w2, b2


def reference_forward(x, params):
    """Pure-JAX reference (eval mode), matching the kernel's bf16 matmul precision."""
    w1, b1, w2, b2 = params
    h = jnp.dot(x.astype(jnp.bfloat16), w1.astype(jnp.bfloat16),
                preferred_element_type=jnp.float32) + b1
    h = jnp.maximum(h, 0.0)
    return h @ w2 + b2


if __name__ == "__main__":
    key = jax.random.PRNGKey(0)
    kx, kp, kd = jax.random.split(key, 3)

    B = 32
    x = jax.random.normal(kx, (B, IN_FEATURES), jnp.float32)
    params = init_params(kp)

    # Training path (dropout active), block_b=16 -> 2 batch tiles exercise the grid.
    out_train = discriminator_forward(x, params, key=kd, training=True, block_b=16)
    out_train = jax.block_until_ready(out_train)
    assert out_train.shape == (B, OUT_FEATURES)
    assert bool(jnp.all(jnp.isfinite(out_train)))

    # Eval path (dropout disabled) checked against the pure-JAX reference.
    out_eval = discriminator_forward(x, params, training=False, block_b=16)
    out_eval = jax.block_until_ready(out_eval)
    ref = reference_forward(x, params)
    assert out_eval.shape == (B, OUT_FEATURES)
    assert jnp.allclose(out_eval, ref, atol=1e-3, rtol=1e-3), "mismatch vs reference"

    print("KERNEL_OK")
</pallas_src>

<mosaic_0001>
module attributes {stable_mosaic.version = 11 : i64} {
  func.func @_disc_kernel(%arg0: i32, %arg1: memref<16x784xbf16, #tpu.memory_space<vmem>>, %arg2: memref<784x256xbf16, #tpu.memory_space<vmem>>, %arg3: memref<1x256xf32, #tpu.memory_space<vmem>>, %arg4: memref<1x256xf32, #tpu.memory_space<vmem>>, %arg5: memref<1x1xf32, #tpu.memory_space<vmem>>, %arg6: memref<16x256xf32, #tpu.memory_space<vmem>>, %arg7: memref<16x1xf32, #tpu.memory_space<vmem>>) attributes {dimension_semantics = [#tpu.dimension_semantics<parallel>], iteration_bounds = array<i64: 2>, scalar_prefetch = 0 : i64, scratch_operands = 0 : i64, tpu.core_type = #tpu.core_type<tc>, window_params = [{transform_indices = @transform_0, window_bounds = array<i64: 16, 784>}, {pipeline_mode = #tpu.pipeline_mode<synchronous>, transform_indices = @transform_1, window_bounds = array<i64: 784, 256>}, {pipeline_mode = #tpu.pipeline_mode<synchronous>, transform_indices = @transform_2, window_bounds = array<i64: 1, 256>}, {pipeline_mode = #tpu.pipeline_mode<synchronous>, transform_indices = @transform_3, window_bounds = array<i64: 1, 256>}, {pipeline_mode = #tpu.pipeline_mode<synchronous>, transform_indices = @transform_4, window_bounds = array<i64: 1, 1>}, {transform_indices = @transform_5, window_bounds = array<i64: 16, 256>}, {transform_indices = @transform_6, window_bounds = array<i64: 16, 1>}]} {
    %c0 = arith.constant 0 : index
    %c0_0 = arith.constant 0 : index
    %0 = vector.load %arg1[%c0, %c0_0] : memref<16x784xbf16, #tpu.memory_space<vmem>>, vector<16x784xbf16>
    %c0_1 = arith.constant 0 : index
    %c0_2 = arith.constant 0 : index
    %1 = vector.load %arg2[%c0_1, %c0_2] : memref<784x256xbf16, #tpu.memory_space<vmem>>, vector<784x256xbf16>
    %cst = arith.constant dense<0.000000e+00> : vector<16x256xf32>
    %2 = tpu.matmul %0, %1, %cst {dimension_numbers = #tpu.dot_dimension_numbers<[1], [0], [0], [1], [0, 0, 1, 1], [], []>} : vector<16x784xbf16>, vector<784x256xbf16>, vector<16x256xf32> -> vector<16x256xf32>
    %c0_3 = arith.constant 0 : index
    %c0_4 = arith.constant 0 : index
    %3 = vector.load %arg3[%c0_3, %c0_4] : memref<1x256xf32, #tpu.memory_space<vmem>>, vector<1x256xf32>
    %4 = vector.broadcast %3 : vector<1x256xf32> to vector<16x256xf32>
    %5 = arith.addf %2, %4 : vector<16x256xf32>
    %cst_5 = arith.constant 0.000000e+00 : f32
    %6 = vector.broadcast %cst_5 : f32 to vector<16x256xf32>
    %7 = arith.maximumf %5, %6 : vector<16x256xf32>
    %c0_6 = arith.constant 0 : index
    %c0_7 = arith.constant 0 : index
    %8 = vector.load %arg6[%c0_6, %c0_7] : memref<16x256xf32, #tpu.memory_space<vmem>>, vector<16x256xf32>
    %cst_8 = arith.constant 1.000000e-01 : f32
    %9 = vector.broadcast %cst_8 : f32 to vector<16x256xf32>
    %10 = arith.cmpf oge, %8, %9 : vector<16x256xf32>
    %cst_9 = arith.constant 0.000000e+00 : f32
    %11 = vector.broadcast %cst_9 : f32 to vector<16x256xf32>
    %12 = arith.select %10, %7, %11 : vector<16x256xi1>, vector<16x256xf32>
    %c0_10 = arith.constant 0 : index
    %c0_11 = arith.constant 0 : index
    %13 = vector.load %arg4[%c0_10, %c0_11] : memref<1x256xf32, #tpu.memory_space<vmem>>, vector<1x256xf32>
    %14 = vector.broadcast %13 : vector<1x256xf32> to vector<16x256xf32>
    %15 = arith.mulf %12, %14 : vector<16x256xf32>
    %cst_12 = arith.constant dense<0.000000e+00> : vector<16xf32>
    %16 = vector.multi_reduction <add>, %15, %cst_12 [1] : vector<16x256xf32> to vector<16xf32>
    %17 = vector.shape_cast %16 : vector<16xf32> to vector<16x1xf32>
    %c0_13 = arith.constant 0 : index
    %c0_14 = arith.constant 0 : index
    %18 = vector.load %arg5[%c0_13, %c0_14] : memref<1x1xf32, #tpu.memory_space<vmem>>, vector<1x1xf32>
    %19 = vector.broadcast %18 : vector<1x1xf32> to vector<16x1xf32>
    %20 = arith.addf %17, %19 : vector<16x1xf32>
    %c0_15 = arith.constant 0 : index
    %c0_16 = arith.constant 0 : index
    %21 = vector.load %arg7[%c0_15, %c0_16] : memref<16x1xf32, #tpu.memory_space<vmem>>, vector<16x1xf32>
    tpu.vector_store %arg7[%c0_15, %c0_16], %20 {strides = array<i32>} : memref<16x1xf32, #tpu.memory_space<vmem>>, vector<16x1xf32>,
    return
  }
  func.func @transform_0(%arg0: i32) -> (i32, i32) {
    %c0_i32 = arith.constant 0 : i32
    %c0_i32_0 = arith.constant 0 : i32
    return %arg0, %c0_i32 : i32, i32
  }
  func.func @transform_1(%arg0: i32) -> (i32, i32) {
    %c0_i32 = arith.constant 0 : i32
    %c0_i32_0 = arith.constant 0 : i32
    %c0_i32_1 = arith.constant 0 : i32
    return %c0_i32, %c0_i32_0 : i32, i32
  }
  func.func @transform_2(%arg0: i32) -> (i32, i32) {
    %c0_i32 = arith.constant 0 : i32
    %c0_i32_0 = arith.constant 0 : i32
    %c0_i32_1 = arith.constant 0 : i32
    return %c0_i32, %c0_i32_0 : i32, i32
  }
  func.func @transform_3(%arg0: i32) -> (i32, i32) {
    %c0_i32 = arith.constant 0 : i32
    %c0_i32_0 = arith.constant 0 : i32
    %c0_i32_1 = arith.constant 0 : i32
    return %c0_i32, %c0_i32_0 : i32, i32
  }
  func.func @transform_4(%arg0: i32) -> (i32, i32) {
    %c0_i32 = arith.constant 0 : i32
    %c0_i32_0 = arith.constant 0 : i32
    %c0_i32_1 = arith.constant 0 : i32
    return %c0_i32, %c0_i32_0 : i32, i32
  }
  func.func @transform_5(%arg0: i32) -> (i32, i32) {
    %c0_i32 = arith.constant 0 : i32
    %c0_i32_0 = arith.constant 0 : i32
    return %arg0, %c0_i32 : i32, i32
  }
  func.func @transform_6(%arg0: i32) -> (i32, i32) {
    %c0_i32 = arith.constant 0 : i32
    %c0_i32_0 = arith.constant 0 : i32
    return %arg0, %c0_i32 : i32, i32
  }
}

</mosaic_0001>

<bundles_post_ra>
// kernel: tpu_custom_call.1
= control target key start
LH: loop header
LB: loop body
LE: loop exit
PB: predicated region body
PF: predicated region fallthrough
CT: control target
= control target key end

     0   :  { %s2058_s0 = inlined_call_operand.hbm [shape: bf16[32,784], index: 0, kind: input, shape index: {}]   ;;  %s2059_s1 = inlined_call_operand.hbm [shape: bf16[784,256], index: 1, kind: input, shape index: {}]   ;;  %s2060_s2 = inlined_call_operand.vmem [shape: f32[1,256], index: 2, kind: input, shape index: {}]   ;;  %s2061_s3 = inlined_call_operand.vmem [shape: f32[1,256], index: 3, kind: input, shape index: {}]   ;;  %s2062_s4 = inlined_call_operand.<no memory space> [shape: f32[1,1], index: 4, kind: input, shape index: {}]   ;;  %s2063_s5 = inlined_call_operand.hbm [shape: f32[32,256], index: 5, kind: input, shape index: {}]   ;;  %s2064_s6 = inlined_call_operand.vmem [shape: f32[32,1], index: 6, kind: output, shape index: {}]  }
   0x1   :  { %v11_v0 = vstv %s2062_s4 }
   0x2   :  { %12 = vst [vmem:[#allocation2] sm:$0x1] %v11_v0 }
   0x3   :  { %13 = vsyncpa [#allocation4], 0 }
   0x4   :  { %15 = vsyncpa [#allocation4 + $0x1], 0 }
   0x5   :  { %16 = vsyncpa [#allocation6], 0  ;;  %s1844_s23 = smov 0   ;;  %s1846_s24 = smov 0  }
   0x6   :  { %s1848_s25 = smov 0   ;;  %s1850_s26 = smov 0  }
   0x7 LB: > { %s1865_s4 = sadd.s32 1, %s1794_s26   ;;  %s29_s27 = sadd.s32 1, %s1790_s25  ;;  %s1794_s26 = sphi %s1850_s26, %s2085_s26   ;;  %s1790_s25 = sphi %s1848_s25, %s2084_s25   ;;  %s1786_s24 = sphi %s1846_s24, %s2083_s24   ;;  %s1782_s23 = sphi %s1844_s23, %s2082_s23  }
   0x8   : > { %s26_s28 = ssub.s32 %s1794_s26, %s1865_s4  ;;  %p36_p0 = scmp.ne.s32.totalorder %s1790_s25, %s1786_s24 }
   0x9   : > { %p27_p1 = scmp.eq.s32.totalorder %s26_s28, 0  ;;  %p37_p2 = scmp.eq.s32.totalorder %s1794_s26, 0 }
   0xa   : > { %p1465_p3 = scmp.lt.s32.totalorder %s1794_s26, 2  ;;  %s224_s30 = sand.u32 1, %s1794_s26  }
   0xb   : > { %s1875_s29 = scalar_select %p27_p1, %s1790_s25, %s29_s27  }
   0xc   : > { %p38_p4 = por %p37_p2, %p36_p0  ;;  %s226_s7 = sand.u32 1, %s1790_s25  }
   0xd   : > { %s1442_s8 = smul.u32 56, %s226_s7  ;;  %s1893_s16 = scalar_lea.sflag [#allocation4], %s224_s30 }
   0xe   : > { %p1881_p5 = pnand %p1465_p3, %p38_p4  ;;  %s1443_s10 = smul.u32 896, %s1794_s26 }
   0xf   : > { %s228_s14 = scalar_lea.vmem [#allocation3], %s1442_s8  ;;  %s1669_s20 = scalar_lea.hbm %s2058_s0, 1792 }
  0x10   : > { %s2071_s9 = scalar_select %p1881_p5, 1, 0 }
  0x11   : > { %s1889_s13 = scalar_lea.hbm %s2058_s0, %s1443_s10  ;;  %s236_s15 = sshll.u32 %s228_s14, 4  ;;  %s1891_s15 = int_to_ptr.vmem [resolvable:$true] %s236_s15 }
  0x12   : > { %s1664_s17 = scalar_lea.hbm %s1889_s13, 896  ;;  %p2066_p7 = pneg %p1881_p5 }
  0x13   : > { %p1665_p6 = scmp.ne.s32.totalorder %s1889_s13, %s1664_s17  ;;  %p1670_p10 = scmp.lt.u32.totalorder %s1889_s13, %s2058_s0 }
  0x14   : > { %p1671_p11 = scmp.lt.u32.totalorder %s1669_s20, %s1664_s17  ;;  %p1673_p13 = scmp.lt.u32.totalorder %s1664_s17, %s1889_s13 }
  0x15   : > { %p1667_p8 = pnand %p2066_p7, %p1665_p6 }
  0x16   : > { %p1672_p12 = por %p1671_p11, %p1670_p10 }
  0x17   : > { %p1668_p9 = pneg %p1667_p8 }
  0x18   : > { %p1674_p0 = por %p1673_p13, %p1672_p12 }
  0x1a   : > { %p1675_p1 = pnand %p1674_p0, %p1668_p9 }
  0x1c   : > { %1678 = shalt.err (!%p1675_p1)
}
  0x1d   : > { %s1679_s27 = scalar_lea.vmem %s1891_s15, 896  ;;  %s1796_s28 = smov [#allocation3]  }
  0x1e   : > { %p1680_p2 = scmp.ne.s32.totalorder %s1891_s15, %s1679_s27  ;;  %s1684_s30 = sshll.u32 %s1796_s28, 4  ;;  %s1685_s30 = int_to_ptr.vmem [resolvable:$false] %s1684_s30 }
  0x1f   : > { %s1686_s8 = scalar_lea.vmem %s1685_s30, 1792  ;;  %p1687_p6 = scmp.lt.s32.totalorder %s1891_s15, %s1685_s30 }
  0x20   : > { %p1682_p3 = pnand %p1680_p2, %p2066_p7  ;;  %p1688_p8 = scmp.lt.s32.totalorder %s1686_s8, %s1679_s27 }
  0x22   : > { %p1683_p4 = pneg %p1682_p3  ;;  %p1689_p10 = por %p1688_p8, %p1687_p6 }
  0x24   : > { %p1690_p11 = pnand %p1689_p10, %p1683_p4 }
  0x26   : > { %1693 = shalt.err (!%p1690_p11)
}
  0x27   : > { %s1797_s10 = smov 448   ;;  %s1798_s11 = smov 28  }
  0x28   : > { %1460 = dma.hbm_to_vmem [thread:$0]  (!%p1881_p5), %s1889_s13, 896, %s1891_s15, %s1893_s16, %s1797_s10, %s1797_s10, %s1798_s11  }
  0x29   : > { %s1306_s12 = sshll.u32 %s226_s7, 5  ;;  %s1924_s14 = sadd.s32 4294967295, %s1794_s26  }
  0x2a   : > { %p42_p9 = scmp.ne.s32.totalorder %s1786_s24, %s1782_s23  ;;  %p2065_p12 = scmp.eq.s32.totalorder %s1924_s14, 0 }
  0x2b   : > { %p1300_p13 = scmp.ge.s32.totalorder %s1794_s26, 1  ;;  %p189_p0 = scmp.lt.s32.totalorder %s1794_s26, 3 }
  0x2c   : > { %p1933_p1 = por %p2065_p12, %p42_p9  ;;  %s1799_s7 = smov [#allocation5]  }
  0x2d   : > { %p1937_p2 = pnand %p1300_p13, %p189_p0  ;;  %s201_s13 = sshll.u32 %s1799_s7, 4  ;;  %s1941_s13 = int_to_ptr.vmem [resolvable:$true] %s201_s13 }
  0x2e   : > { %s2072_s17 = scalar_select %p1933_p1, 1, 0 }
  0x2f   : > { %s2073_s18 = scalar_select %p1937_p2, 1, 0 }
  0x30   : > { %p1453_p3 = pneg %p1937_p2  ;;  %s1425_s23 = sshll.u32 %s1794_s26, 9 }
  0x31   : > { %s250_s15 = scalar_lea.vmem [#allocation7], %s1306_s12  ;;  %s1955_s27 = scalar_lea.hbm %s2063_s5, %s1425_s23 }
  0x32   : > { %s258_s19 = sshll.u32 %s250_s15, 4  ;;  %p1948_p4 = pnand %p1453_p3, %p2065_p12  ;;  %s1957_s19 = int_to_ptr.vmem [resolvable:$true] %s258_s19 }
  0x33   : > { %s1694_s8 = scalar_lea.hbm %s2059_s1, 12544 }
  0x34   : > { %p1695_p6 = scmp.ne.s32.totalorder %s2059_s1, %s1694_s8  ;;  %p1696_p8 = pneg %p1948_p4 }
  0x35   : > { %p1701_p9 = scmp.lt.u32.totalorder %s1694_s8, %s2059_s1 }
  0x36   : > { %p1697_p10 = pnand %p1696_p8, %p1695_p6 }
  0x38   : > { %p1698_p11 = pneg %p1697_p10 }
  0x3a   : > { %p1703_p13 = pnand %p1701_p9, %p1698_p11 }
  0x3c   : > { %1706 = shalt.err (!%p1703_p13)
}
  0x3d   : > { %s1707_s7 = scalar_lea.vmem %s1941_s13, 12544  ;;  %p1715_p7 = scmp.lt.s32.totalorder %s1941_s13, %s1941_s13 }
  0x3e   : > { %p1708_p0 = scmp.ne.s32.totalorder %s1941_s13, %s1707_s7  ;;  %p1716_p1 = scmp.lt.s32.totalorder %s1707_s7, %s1707_s7 }
  0x40   : > { %p1710_p3 = pnand %p1708_p0, %p1696_p8  ;;  %p1717_p2 = por %p1716_p1, %p1715_p7 }
  0x42   : > { %p1711_p12 = pneg %p1710_p3 }
  0x44   : > { %p1718_p5 = pnand %p1717_p2, %p1711_p12 }
  0x46   : > { %1721 = shalt.err (!%p1718_p5)
}
  0x47   : > { %s1800_s23 = smov 128   ;;  %s1801_s15 = smov 8  }
  0x48   : > { %1456 = dma.hbm_to_vmem [thread:$0]  (!%p1948_p4), %s2059_s1, 12544, %s1941_s13, [#allocation6], %s1800_s23, %s1800_s23, %s1801_s15  }
  0x49   : > { %s1722_s28 = scalar_lea.hbm %s1955_s27, 512  ;;  %p2075_p8 = scmp.ne.s32.totalorder %s2071_s9, 0 }
  0x4a   : > { %p1723_p6 = scmp.ne.s32.totalorder %s1955_s27, %s1722_s28  ;;  %s1727_s26 = scalar_lea.hbm %s2063_s5, 1024 }
  0x4b   : > { %p2076_p7 = pneg %p2075_p8  ;;  %p1728_p1 = scmp.lt.u32.totalorder %s1955_s27, %s2063_s5 }
  0x4c   : > { %p1729_p2 = scmp.lt.u32.totalorder %s1727_s26, %s1722_s28  ;;  %p1731_p11 = scmp.lt.u32.totalorder %s1722_s28, %s1955_s27 }
  0x4d   : > { %p1725_p12 = pnand %p1723_p6, %p2076_p7 }
  0x4e   : > { %p1730_p10 = por %p1729_p2, %p1728_p1 }
  0x4f   : > { %p1726_p5 = pneg %p1725_p12 }
  0x50   : > { %p1732_p9 = por %p1731_p11, %p1730_p10 }
  0x52   : > { %p1733_p13 = pnand %p1732_p9, %p1726_p5 }
  0x54   : > { %1736 = shalt.err (!%p1733_p13)
}
  0x55   : > { %s1737_s13 = scalar_lea.vmem %s1957_s19, 512  ;;  %p2077_p0 = pmov %p2076_p7 }
  0x56   : > { %p1738_p4 = scmp.ne.s32.totalorder %s1957_s19, %s1737_s13  ;;  %s1802_s20 = smov [#allocation7]  }
  0x57   : > { %s1742_s12 = sshll.u32 %s1802_s20, 4  ;;  %s1743_s12 = int_to_ptr.vmem [resolvable:$false] %s1742_s12 }
  0x58   : > { %p1740_p3 = pnand %p1738_p4, %p2077_p0  ;;  %s1744_s7 = scalar_lea.vmem %s1743_s12, 1024 }
  0x59   : > { %p1745_p7 = scmp.lt.s32.totalorder %s1957_s19, %s1743_s12  ;;  %p1746_p12 = scmp.lt.s32.totalorder %s1744_s7, %s1737_s13 }
  0x5a   : > { %p1741_p6 = pneg %p1740_p3 }
  0x5b   : > { %p1747_p1 = por %p1746_p12, %p1745_p7 }
  0x5d   : > { %p1748_p2 = pnand %p1747_p1, %p1741_p6 }
  0x5f   : > { %1751 = shalt.err (!%p1748_p2)
}
  0x60   : > { %s1803_s23 = smov 256   ;;  %s1804_s15 = smov 16  }
  0x61   : > { %1463 = dma.hbm_to_vmem [thread:$0]  (!%p2075_p8), %s1955_s27, 512, %s1957_s19, %s1893_s16, %s1803_s23, %s1803_s23, %s1804_s15  }
  0x62   : > { %p2078_p5 = scmp.ne.s32.totalorder %s2073_s18, 0 }
  0x63   : > { %s272_s21 = sand.u32 (!%p2078_p5), 1, %s1924_s14   ;;  %s274_s22 = sand.u32 (!%p2078_p5), 1, %s1786_s24  }
  0x64   : > { %270 = sbr.rel (%p2078_p5) target bundleno = 616 (0x268), region = 44  ;;  %s273_s30 = scalar_lea.sflag (!%p2078_p5), [#allocation4], %s272_s21 }
  0x65   : > { %s1444_s28 = smul.u32 (!%p2078_p5), 56, %s274_s22  ;;  %p2079_p10 = scmp.ne.s32.totalorder (!%p2078_p5), %s2072_s17, 0 }
  0x67   : > { %s2008_s8 = scalar_lea.vmem (!%p2078_p5), [#allocation3], %s1444_s28 }
  0x6b   : > { %1769 = dma.done.wait (%p2079_p10), %s273_s30, 896  }
  0x6c   : > { %1771 = vsyncadd (%p2079_p10), %s273_s30, 4294966400  ;;  %p2080_p11 = scmp.eq.s32.totalorder %s1924_s14, 0 }
  0x6e   : > { %1773 = dma.done.wait (%p2080_p11), [#allocation6], 12544   ;;  %p2081_p8 = pmov %p2080_p11 }
  0x6f   : > { %s1312_s9 = sshll.u32 %s274_s22, 5 }
  0x70   : > { %1775 = vsyncadd (%p2081_p8), [#allocation6], 4294954752  ;;  %s2018_s16 = scalar_lea.vmem [#allocation7], %s1312_s9 }
  0x71   : > { %1777 = dma.done.wait (%p2079_p10), %s273_s30, 512  }
  0x72   : > { %1779 = vsyncadd (%p2079_p10), %s273_s30, 4294966784  ;;  %v1507_v1 = vld [vmem:[#allocation5 + $0x4] ss:$8 sps:$4 sm:$0xff]   ;;  %v1509_v2 = vld [vmem:[#allocation5] ss:$8 sps:$4 sm:$0xff]   ;;  %vm975_vm0 = vcmask 130048  }
  0x73   : > { %979 = vmatprep.subr.bf16.mxu1 %v1507_v1  ;;  %v1510_v3 = vld [vmem:[#allocation5 + $0x14] ss:$8 sps:$4 sm:$0xff]   ;;  %v1512_v4 = vld [vmem:[#allocation5 + $0x10] ss:$8 sps:$4 sm:$0xff]   ;;  %v1513_v5 = vld [vmem:[#allocation5 + $0x24] ss:$8 sps:$4 sm:$0xff]  }
  0x74   : > { %980 = vmatpush1.bf16.msra.mxu1 %v1509_v2  ;;  %v1515_v6 = vld [vmem:[#allocation5 + $0x20] ss:$8 sps:$4 sm:$0xff]   ;;  %v1516_v7 = vld [vmem:[#allocation5 + $0x34] ss:$8 sps:$4 sm:$0xff]   ;;  %v1518_v8 = vld [vmem:[#allocation5 + $0x30] ss:$8 sps:$4 sm:$0xff]  }
  0x75   : > { %981 = vmatprep.subr.bf16.mxu1 %v1510_v3  ;;  %v1519_v9 = vld [vmem:[#allocation5 + $0x44] ss:$8 sps:$4 sm:$0xff]   ;;  %v1521_v11 = vld [vmem:[#allocation5 + $0x40] ss:$8 sps:$4 sm:$0xff]   ;;  %v1522_v12 = vld [vmem:[#allocation5 + $0x54] ss:$8 sps:$4 sm:$0xff]  }
  0x76   : > { %v1537_v10 = vld [vmem:[#allocation5 + $0x204] ss:$8 sps:$4 sm:$0xff]   ;;  %v1541_v13 = vld [vmem:[#allocation5 + $0x200] ss:$8 sps:$4 sm:$0xff]   ;;  %v1543_v14 = vld [vmem:[#allocation5 + $0x214] ss:$8 sps:$4 sm:$0xff]  }
  0x77   : > { %1065 = vmatprep.subr.bf16.mxu0 %v1537_v10  ;;  %v1524_v15 = vld [vmem:[#allocation5 + $0x50] ss:$8 sps:$4 sm:$0xff]   ;;  %v1549_v17 = vld [vmem:[#allocation5 + $0x224] ss:$8 sps:$4 sm:$0xff]   ;;  %v1553_v19 = vld [vmem:[#allocation5 + $0x220] ss:$8 sps:$4 sm:$0xff]  }
  0x78   : > { %982 = vmatpush1.bf16.msra.mxu1 %v1512_v4  ;;  %1066 = vmatpush1.bf16.msra.mxu0 %v1541_v13  ;;  %v1547_v16 = vld [vmem:[#allocation5 + $0x210] ss:$8 sps:$4 sm:$0xff]   ;;  %v1525_v18 = vld [vmem:[#allocation5 + $0x64] ss:$8 sps:$4 sm:$0xff]   ;;  %v1555_v20 = vld [vmem:[#allocation5 + $0x234] ss:$8 sps:$4 sm:$0xff]  }
  0x79   : > { %983 = vmatprep.subr.bf16.mxu1 %v1513_v5  ;;  %1067 = vmatprep.subr.bf16.mxu0 %v1543_v14  ;;  %v1527_v21 = vld [vmem:[#allocation5 + $0x60] ss:$8 sps:$4 sm:$0xff]   ;;  %v1528_v22 = vld [vmem:[#allocation5 + $0x74] ss:$8 sps:$4 sm:$0xff]   ;;  %v1559_v23 = vld [vmem:[#allocation5 + $0x230] ss:$8 sps:$4 sm:$0xff]  }
  0x7a   : > { %v1561_v24 = vld [vmem:[#allocation5 + $0x244] ss:$8 sps:$4 sm:$0xff]   ;;  %v1530_v25 = vld [vmem:[#allocation5 + $0x70] ss:$8 sps:$4 sm:$0xff]   ;;  %v1565_v27 = vld [vmem:[#allocation5 + $0x240] ss:$8 sps:$4 sm:$0xff]  }
  0x7b   : > { %v1531_v26 = vld [vmem:[#allocation5 + $0x84] ss:$8 sps:$4 sm:$0xff]   ;;  %v1567_v28 = vld [vmem:[#allocation5 + $0x254] ss:$8 sps:$4 sm:$0xff]   ;;  %v1533_v29 = vld [vmem:[#allocation5 + $0x80] ss:$8 sps:$4 sm:$0xff]  }
  0x7c   : > { %984 = vmatpush1.bf16.msra.mxu1 %v1515_v6  ;;  %1068 = vmatpush1.bf16.msra.mxu0 %v1547_v16  ;;  %v1577_v30 = vld [vmem:[%s2008_s8 + $0x4] ss:$28 sps:$4 sm:$0xff]   ;;  %v1638_v58 = vld [vmem:[%s2008_s8 + $0x14] ss:$28 sps:$4 sm:$0xff]   ;;  %s1313_s26 = sshll.u32 %s1924_s14, 1  ;;  %vm1198_vm5 = vcmask 7168  }
  0x7d   : > { %985 = vmatprep.subr.bf16.mxu1 %v1516_v7  ;;  %1069 = vmatprep.subr.bf16.mxu0 %v1549_v17  ;;  %v1534_v31 = vld [vmem:[#allocation5 + $0x94] ss:$8 sps:$4 sm:$0xff]   ;;  %v1571_v32 = vld [vmem:[#allocation5 + $0x250] ss:$8 sps:$4 sm:$0xff]   ;;  %v1573_v33 = vld [vmem:[#allocation5 + $0x264] ss:$8 sps:$4 sm:$0xff]  }
  0x7e   : > { %1011 = vmatprep.mubr.bf16.mxu1 %v1577_v30  ;;  %v1536_v34 = vld [vmem:[#allocation5 + $0x90] ss:$8 sps:$4 sm:$0xff]   ;;  %v1539_v35 = vld [vmem:[#allocation5 + $0xa4] ss:$8 sps:$4 sm:$0xff]   ;;  %v1581_v36 = vld [vmem:[#allocation5 + $0x260] ss:$8 sps:$4 sm:$0xff]   ;;  %1097 = vmatprep.mubr.bf16.mxu0 %v1638_v58 }
  0x7f   : > { %v1582_v37 = vld [vmem:[#allocation5 + $0x274] ss:$8 sps:$4 sm:$0xff]   ;;  %v1542_v38 = vld [vmem:[#allocation5 + $0xa0] ss:$8 sps:$4 sm:$0xff]   ;;  %v1587_v40 = vld [vmem:[#allocation5 + $0x270] ss:$8 sps:$4 sm:$0xff]  }
  0x80   : > { %986 = vmatpush1.bf16.msra.mxu1 %v1518_v8  ;;  %1070 = vmatpush1.bf16.msra.mxu0 %v1553_v19  ;;  %v1545_v39 = vld [vmem:[#allocation5 + $0xb4] ss:$8 sps:$4 sm:$0xff]   ;;  %v1588_v41 = vld [vmem:[#allocation5 + $0x284] ss:$8 sps:$4 sm:$0xff]   ;;  %v1548_v42 = vld [vmem:[#allocation5 + $0xb0] ss:$8 sps:$4 sm:$0xff]  }
  0x81   : > { %987 = vmatprep.subr.bf16.mxu1 %v1519_v9  ;;  %1071 = vmatprep.subr.bf16.mxu0 %v1555_v20  ;;  %v1551_v43 = vld [vmem:[#allocation5 + $0xc4] ss:$8 sps:$4 sm:$0xff]   ;;  %v1593_v44 = vld [vmem:[#allocation5 + $0x280] ss:$8 sps:$4 sm:$0xff]   ;;  %v1594_v45 = vld [vmem:[#allocation5 + $0x294] ss:$8 sps:$4 sm:$0xff]  }
  0x82   : > { %v1554_v46 = vld [vmem:[#allocation5 + $0xc0] ss:$8 sps:$4 sm:$0xff]   ;;  %v1557_v47 = vld [vmem:[#allocation5 + $0xd4] ss:$8 sps:$4 sm:$0xff]   ;;  %v1599_v48 = vld [vmem:[#allocation5 + $0x290] ss:$8 sps:$4 sm:$0xff]  }
  0x83   : > { %v1600_v49 = vld [vmem:[#allocation5 + $0x2a4] ss:$8 sps:$4 sm:$0xff]   ;;  %v1560_v50 = vld [vmem:[#allocation5 + $0xd0] ss:$8 sps:$4 sm:$0xff]   ;;  %v1605_v52 = vld [vmem:[#allocation5 + $0x2a0] ss:$8 sps:$4 sm:$0xff]  }
  0x84   : > { %988 = vmatpush1.bf16.msra.mxu1 %v1521_v11  ;;  %1072 = vmatpush1.bf16.msra.mxu0 %v1559_v23  ;;  %v1563_v51 = vld [vmem:[#allocation5 + $0xe4] ss:$8 sps:$4 sm:$0xff]   ;;  %v1606_v53 = vld [vmem:[#allocation5 + $0x2b4] ss:$8 sps:$4 sm:$0xff]   ;;  %v1566_v54 = vld [vmem:[#allocation5 + $0xe0] ss:$8 sps:$4 sm:$0xff]  }
  0x85   : > { %989 = vmatprep.subr.bf16.mxu1 %v1522_v12  ;;  %1073 = vmatprep.subr.bf16.mxu0 %v1561_v24  ;;  %v1569_v55 = vld [vmem:[#allocation5 + $0xf4] ss:$8 sps:$4 sm:$0xff]   ;;  %v1611_v56 = vld [vmem:[#allocation5 + $0x2b0] ss:$8 sps:$4 sm:$0xff]   ;;  %v1612_v57 = vld [vmem:[#allocation5 + $0x2c4] ss:$8 sps:$4 sm:$0xff]  }
  0x86   : > { %v1572_v59 = vld [vmem:[#allocation5 + $0xf0] ss:$8 sps:$4 sm:$0xff]   ;;  %v1580_v60 = vld [vmem:[#allocation5 + $0x104] ss:$8 sps:$4 sm:$0xff]   ;;  %v1617_v61 = vld [vmem:[#allocation5 + $0x2c0] ss:$8 sps:$4 sm:$0xff]  }
  0x87   : > { %v1575_v62 = vld [vmem:[%s2008_s8] ss:$28 sps:$4 sm:$0xff]   ;;  %v1618_v63 = vld [vmem:[#allocation5 + $0x2d4] ss:$8 sps:$4 sm:$0xff]   ;;  %v1805_v19 = vmov 0   ;;  %p326_p9 = scmp.lt.s32.totalorder %s1313_s26, 3 }
  0x88   : > { %990 = vmatpush1.bf16.msra.mxu1 %v1524_v15  ;;  %1074 = vmatpush1.bf16.msra.mxu0 %v1565_v27  ;;  %v1578_v0 = vld [vmem:[#allocation5 + $0x100] ss:$8 sps:$4 sm:$0xff]   ;;  %v1586_v1 = vld [vmem:[#allocation5 + $0x114] ss:$8 sps:$4 sm:$0xff]   ;;  %v1623_v2 = vld [vmem:[#allocation5 + $0x2d0] ss:$8 sps:$4 sm:$0xff]  }
  0x89   : > { %991 = vmatprep.subr.bf16.mxu1 %v1525_v18  ;;  %1075 = vmatprep.subr.bf16.mxu0 %v1567_v28  ;;  %v1624_v3 = vld [vmem:[#allocation5 + $0x2e4] ss:$8 sps:$4 sm:$0xff]   ;;  %v1584_v4 = vld [vmem:[#allocation5 + $0x110] ss:$8 sps:$4 sm:$0xff]   ;;  %v1629_v6 = vld [vmem:[#allocation5 + $0x2e0] ss:$8 sps:$4 sm:$0xff]  }
  0x8a   : > { %v1592_v5 = vld [vmem:[#allocation5 + $0x124] ss:$8 sps:$4 sm:$0xff]   ;;  %v1630_v7 = vld [vmem:[#allocation5 + $0x2f4] ss:$8 sps:$4 sm:$0xff]   ;;  %v1590_v9 = vld [vmem:[#allocation5 + $0x120] ss:$8 sps:$4 sm:$0xff]  }
  0x8b   : > { %v1663_v8 = vld [vmem:[%s2008_s8 + $0xc] ss:$28 sps:$4 sm:$0xff]   ;;  %v1647_v12 = vld [vmem:[#allocation5 + $0x304] ss:$8 sps:$4 sm:$0xff]   ;;  %v1645_v16 = vld [vmem:[#allocation5 + $0x300] ss:$8 sps:$4 sm:$0xff]  }
  0x8c   : > { %992 = vmatpush1.bf16.msra.mxu1 %v1527_v21  ;;  %1076 = vmatpush1.bf16.msra.mxu0 %v1571_v32  ;;  %v1598_v10 = vld [vmem:[#allocation5 + $0x134] ss:$8 sps:$4 sm:$0xff]   ;;  %v1635_v11 = vld [vmem:[#allocation5 + $0x2f0] ss:$8 sps:$4 sm:$0xff]   ;;  %v1604_v14 = vld [vmem:[#allocation5 + $0x144] ss:$8 sps:$4 sm:$0xff]  }
  0x8d   : > { %993 = vmatprep.subr.bf16.mxu1 %v1528_v22  ;;  %1077 = vmatprep.subr.bf16.mxu0 %v1573_v33  ;;  %v1596_v13 = vld [vmem:[#allocation5 + $0x130] ss:$8 sps:$4 sm:$0xff]   ;;  %v1602_v17 = vld [vmem:[#allocation5 + $0x140] ss:$8 sps:$4 sm:$0xff]   ;;  %v1610_v18 = vld [vmem:[#allocation5 + $0x154] ss:$8 sps:$4 sm:$0xff]  }
  0x8e   : > { %v1636_v15 = vld [vmem:[%s2008_s8 + $0x10] ss:$28 sps:$4 sm:$0xff]   ;;  %v1616_v21 = vld [vmem:[#allocation5 + $0x164] ss:$8 sps:$4 sm:$0xff]   ;;  %s2087_s26 = smov (!%p326_p9, %s1313_s26), 3 }
  0x8f   : > { %v1608_v20 = vld [vmem:[#allocation5 + $0x150] ss:$8 sps:$4 sm:$0xff]   ;;  %v1614_v22 = vld [vmem:[#allocation5 + $0x160] ss:$8 sps:$4 sm:$0xff]   ;;  %v1622_v23 = vld [vmem:[#allocation5 + $0x174] ss:$8 sps:$4 sm:$0xff]  }
  0x90   : > { %994 = vmatpush1.bf16.msra.mxu1 %v1530_v25  ;;  %1078 = vmatpush1.bf16.msra.mxu0 %v1581_v36  ;;  %v1651_v24 = vld [vmem:[%s2008_s8 + $0x18] ss:$28 sps:$4 sm:$0xff]   ;;  %v1620_v25 = vld [vmem:[#allocation5 + $0x170] ss:$8 sps:$4 sm:$0xff]   ;;  %s1314_s10 = sshll.u32 %s2087_s26, 3 }
  0x91   : > { %995 = vmatprep.subr.bf16.mxu1 %v1531_v26  ;;  %1079 = vmatprep.subr.bf16.mxu0 %v1582_v37  ;;  %v1628_v26 = vld [vmem:[#allocation5 + $0x184] ss:$8 sps:$4 sm:$0xff]   ;;  %v1626_v27 = vld [vmem:[#allocation5 + $0x180] ss:$8 sps:$4 sm:$0xff]   ;;  %v1634_v28 = vld [vmem:[#allocation5 + $0x194] ss:$8 sps:$4 sm:$0xff]   ;;  %s329_s20 = scalar_lea.vmem %s2064_s6, %s1314_s10 }
  0x92   : > { %v1641_v30 = vld [vmem:[#allocation5 + $0x1a4] ss:$8 sps:$4 sm:$0xff]   ;;  %v1644_v32 = vld [vmem:[#allocation5 + $0x1b4] ss:$8 sps:$4 sm:$0xff]   ;;  %v1642_v33 = vld [vmem:[#allocation5 + $0x1b0] ss:$8 sps:$4 sm:$0xff]  }
  0x93   : > { %v1654_v36 = vld [vmem:[#allocation5 + $0x1d4] ss:$8 sps:$4 sm:$0xff]   ;;  %v1652_v37 = vld [vmem:[#allocation5 + $0x1d0] ss:$8 sps:$4 sm:$0xff]  }
  0x94   : > { %996 = vmatpush1.bf16.msra.mxu1 %v1533_v29  ;;  %1080 = vmatpush1.bf16.msra.mxu0 %v1587_v40  ;;  %v1632_v29 = vld [vmem:[#allocation5 + $0x190] ss:$8 sps:$4 sm:$0xff]   ;;  %v1660_v40 = vld [vmem:[#allocation5 + $0x1f4] ss:$8 sps:$4 sm:$0xff]  }
  0x95   : > { %997 = vmatprep.subr.bf16.mxu1 %v1534_v31  ;;  %1081 = vmatprep.subr.bf16.mxu0 %v1588_v41  ;;  %v1639_v31 = vld [vmem:[#allocation5 + $0x1a0] ss:$8 sps:$4 sm:$0xff]   ;;  %v1658_v41 = vld [vmem:[#allocation5 + $0x1f0] ss:$8 sps:$4 sm:$0xff]  }
  0x96   : > { %v1167_v58 = vld [vmem:[%s2061_s3] sm:$0x3] }
  0x98   : > { %998 = vmatpush1.bf16.msra.mxu1 %v1536_v34  ;;  %1082 = vmatpush1.bf16.msra.mxu0 %v1593_v44  ;;  %v1650_v34 = vld [vmem:[#allocation5 + $0x1c4] ss:$8 sps:$4 sm:$0xff]  }
  0x99   : > { %999 = vmatprep.subr.bf16.mxu1 %v1539_v35  ;;  %1083 = vmatprep.subr.bf16.mxu0 %v1594_v45  ;;  %v1648_v35 = vld [vmem:[#allocation5 + $0x1c0] ss:$8 sps:$4 sm:$0xff]  }
  0x9c   : > { %1000 = vmatpush1.bf16.msra.mxu1 %v1542_v38  ;;  %1084 = vmatpush1.bf16.msra.mxu0 %v1599_v48  ;;  %v1657_v38 = vld [vmem:[#allocation5 + $0x1e4] ss:$8 sps:$4 sm:$0xff]  }
  0x9d   : > { %1001 = vmatprep.subr.bf16.mxu1 %v1545_v39  ;;  %1085 = vmatprep.subr.bf16.mxu0 %v1600_v49  ;;  %v1655_v39 = vld [vmem:[#allocation5 + $0x1e0] ss:$8 sps:$4 sm:$0xff]  }
  0xa0   : > { %1002 = vmatpush1.bf16.msra.mxu1 %v1548_v42  ;;  %1086 = vmatpush1.bf16.msra.mxu0 %v1605_v52  ;;  %v1661_v42 = vld [vmem:[%s2008_s8 + $0x8] ss:$28 sps:$4 sm:$0xff]  }
  0xa1   : > { %1003 = vmatprep.subr.bf16.mxu1 %v1551_v43  ;;  %1087 = vmatprep.subr.bf16.mxu0 %v1606_v53 }
  0xa4   : > { %1004 = vmatpush1.bf16.msra.mxu1 %v1554_v46  ;;  %1088 = vmatpush1.bf16.msra.mxu0 %v1611_v56 }
  0xa5   : > { %1005 = vmatprep.subr.bf16.mxu1 %v1557_v47  ;;  %1089 = vmatprep.subr.bf16.mxu0 %v1612_v57  ;;  %v440_v47 = vlaneseq  ;;  %v1155_v57 = vld [vmem:[%s2018_s16] sm:$0xff] }
  0xa6   : > { %vm1159_vm1 = vcmp.ge.f32.partialorder %v1155_v57, 0.1 }
  0xa7   : > { %v441_v48 = vshrl.u32 %v440_v47, 7 }
  0xa8   : > { %1006 = vmatpush1.bf16.msra.mxu1 %v1560_v50  ;;  %1090 = vmatpush1.bf16.msra.mxu0 %v1617_v61  ;;  %v438_v50 = vld [vmem:[%s2060_s2] sm:$0x3]  ;;  %v1156_v61 = vld [vmem:[%s2018_s16 + $0x8] sm:$0xff] }
  0xa9   : > { %1007 = vmatprep.subr.bf16.mxu1 %v1563_v51  ;;  %1091 = vmatprep.subr.bf16.mxu0 %v1618_v63  ;;  %v442_v49 = vsub.s32 0, %v441_v48  ;;  %v446_v51 = vsub.s32 1, %v441_v48  ;;  %vm1160_vm2 = vcmp.ge.f32.partialorder %v1156_v61, 0.1 }
  0xab   : > { %v443_v52 = vrot.slane %v438_v50, %v442_v49  ;;  %v447_v53 = vrot.slane %v438_v50, %v446_v51 }
  0xac   : > { %1008 = vmatpush1.bf16.msra.mxu1 %v1566_v54  ;;  %1092 = vmatpush1.bf16.msra.mxu0 %v1623_v2 }
  0xad   : > { %1009 = vmatprep.subr.bf16.mxu1 %v1569_v55  ;;  %1093 = vmatprep.subr.bf16.mxu0 %v1624_v3 }
  0xb0   : > { %1010 = vmatpush1.bf16.msra.mxu1 %v1572_v59  ;;  %1094 = vmatpush1.bf16.msra.mxu0 %v1629_v6 }
  0xb1   : > { %1022 = vmatprep.subr.bf16.mxu1 %v1580_v60  ;;  %1095 = vmatprep.subr.bf16.mxu0 %v1630_v7 }
  0xb3   : > { %1012 = vmatmul.mubr.bf16.vlgmr.msra.gmra.mrb[0].mxu1 %v1575_v62 }
  0xb4   : > { %1023 = vmatpush1.bf16.msra.mxu1 %v1578_v0  ;;  %1054 = vmatprep.mubr.bf16.mxu1 %v1663_v8  ;;  %v1176_v8 = vrot.slane %v1167_v58, %v446_v51 }
  0xb5   : > { %1024 = vmatprep.subr.bf16.mxu1 %v1586_v1  ;;  %1096 = vmatpush1.bf16.msra.mxu0 %v1635_v11  ;;  %v1157_v1 = vld [vmem:[%s2018_s16 + $0x10] sm:$0xff] }
  0xb6   : > { %1108 = vmatprep.subr.bf16.mxu0 %v1647_v12  ;;  %vm1161_vm3 = vcmp.ge.f32.partialorder %v1157_v1, 0.1 }
  0xb8   : > { %1025 = vmatpush1.bf16.msra.mxu1 %v1584_v4  ;;  %1098 = vmatmul.mubr.bf16.vlgmr.msra.gmra.mrb[0].mxu0 %v1636_v15  ;;  %v1172_v4 = vrot.slane %v1167_v58, %v442_v49 }
  0xb9   : > { %1026 = vmatprep.subr.bf16.mxu1 %v1592_v5  ;;  %1109 = vmatpush1.bf16.msra.mxu0 %v1645_v16  ;;  %v1158_v5 = vld [vmem:[%s2018_s16 + $0x18] sm:$0xff] }
  0xba   : > { %1140 = vmatprep.mubr.bf16.mxu0 %v1805_v19  ;;  %vm1162_vm4 = vcmp.ge.f32.partialorder %v1158_v5, 0.1 }
  0xbc   : > { %1027 = vmatpush1.bf16.msra.mxu1 %v1590_v9 }
  0xbd   : > { %1028 = vmatprep.subr.bf16.mxu1 %v1598_v10 }
  0xc0   : > { %1029 = vmatpush1.bf16.msra.mxu1 %v1596_v13 }
  0xc1   : > { %1030 = vmatprep.subr.bf16.mxu1 %v1604_v14 }
  0xc4   : > { %1031 = vmatpush1.bf16.msra.mxu1 %v1602_v17  ;;  %1420 = vmatmul.mubr.msk.bf16.vlgmr.msra.gmra.mrb[0].mxu0 %vm975_vm0, %v1651_v24 }
  0xc5   : > { %1032 = vmatprep.subr.bf16.mxu1 %v1610_v18 }
  0xc8   : > { %1033 = vmatpush1.bf16.msra.mxu1 %v1608_v20 }
  0xc9   : > { %1034 = vmatprep.subr.bf16.mxu1 %v1616_v21 }
  0xcc   : > { %1035 = vmatpush1.bf16.msra.mxu1 %v1614_v22 }
  0xcd   : > { %1036 = vmatprep.subr.bf16.mxu1 %v1622_v23  ;;  %v1421_v23 = vld [vmem:[#allocation2] ss:$0 sm:$0xff] }
  0xd0   : > { %1037 = vmatpush1.bf16.msra.mxu1 %v1620_v25 }
  0xd1   : > { %1038 = vmatprep.subr.bf16.mxu1 %v1628_v26 }
  0xd4   : > { %1039 = vmatpush1.bf16.msra.mxu1 %v1626_v27 }
  0xd5   : > { %1040 = vmatprep.subr.bf16.mxu1 %v1634_v28 }
  0xd8   : > { %1041 = vmatpush1.bf16.msra.mxu1 %v1632_v29 }
  0xd9   : > { %1042 = vmatprep.subr.bf16.mxu1 %v1641_v30 }
  0xdc   : > { %1043 = vmatpush1.bf16.msra.mxu1 %v1639_v31 }
  0xdd   : > { %1044 = vmatprep.subr.bf16.mxu1 %v1644_v32 }
  0xe0   : > { %1045 = vmatpush1.bf16.msra.mxu1 %v1642_v33 }
  0xe1   : > { %1046 = vmatprep.subr.bf16.mxu1 %v1650_v34 }
  0xe4   : > { %1047 = vmatpush1.bf16.msra.mxu1 %v1648_v35 }
  0xe5   : > { %1048 = vmatprep.subr.bf16.mxu1 %v1654_v36 }
  0xe8   : > { %1049 = vmatpush1.bf16.msra.mxu1 %v1652_v37 }
  0xe9   : > { %1050 = vmatprep.subr.bf16.mxu1 %v1657_v38 }
  0xec   : > { %1051 = vmatpush1.bf16.msra.mxu1 %v1655_v39 }
  0xed   : > { %1052 = vmatprep.subr.bf16.mxu1 %v1660_v40 }
  0xf0   : > { %1053 = vmatpush1.bf16.msra.mxu1 %v1658_v41 }
  0xf3   : > { %1055 = vmatmul.mubr.bf16.vlgmr.msra.gmra.mrb[0].mxu1 %v1661_v42 }
 0x197   : > { %v1142_v43 = vpop.f32.mrb[0].mxu0 }
 0x198   : > { %v1144_v44 = vpop.f32.mrb[1].mxu0 }
 0x199   : > { %v1146_v45 = vpop.f32.mrb[2].mxu0 }
 0x19a   : > { %v1148_v46 = vpop.f32.mrb[3].mxu0 }
 0x1c6   : > { %v1056_v54 = vpop.f32.mrb[0].mxu1 }
 0x1c7   : > { %v1426_v55 = vadd.f32 %v1056_v54, %v443_v52  ;;  %v1058_v56 = vpop.f32.mrb[1].mxu1 }
 0x1c8   : > { %v1428_v59 = vadd.f32 %v1058_v56, %v447_v53  ;;  %v1060_v60 = vpop.f32.mrb[2].mxu1 }
 0x1c9   : > { %v1427_v62 = vadd.f32 %v1426_v55, %v1142_v43  ;;  %v1430_v63 = vadd.f32 %v1060_v60, %v443_v52  ;;  %v1062_v0 = vpop.f32.mrb[3].mxu1 }
 0x1ca   : > { %v1429_v2 = vadd.f32 %v1428_v59, %v1144_v44  ;;  %v1432_v3 = vadd.f32 %v1062_v0, %v447_v53 }
 0x1cb   : > { %v1151_v6 = vmax.f32 %v1427_v62, 0.0  ;;  %v1431_v7 = vadd.f32 %v1430_v63, %v1146_v45 }
 0x1cc   : > { %v1152_v9 = vmax.f32 %v1429_v2, 0.0  ;;  %v1433_v10 = vadd.f32 %v1432_v3, %v1148_v46 }
 0x1cd   : > { %v1153_v11 = vmax.f32 %v1431_v7, 0.0  ;;  %v1163_v12 = vsel %vm1159_vm1, %v1151_v6, 0.0 }
 0x1ce   : > { %v1154_v13 = vmax.f32 %v1433_v10, 0.0  ;;  %v1164_v14 = vsel %vm1160_vm2, %v1152_v9, 0.0  ;;  %v1179_v15 = vmul.f32 %v1172_v4, %v1163_v12 }
 0x1cf   : > { %v1180_v16 = vmul.f32 %v1176_v8, %v1164_v14  ;;  %v1165_v17 = vsel %vm1161_vm3, %v1153_v11, 0.0 }
 0x1d0   : > { %v1166_v18 = vsel %vm1162_vm4, %v1154_v13, 0.0  ;;  %v1181_v19 = vmul.f32 %v1172_v4, %v1165_v17 }
 0x1d1   : > { %v1183_v20 = vadd.f32 %v1180_v16, %v1179_v15  ;;  %v1182_v21 = vmul.f32 %v1176_v8, %v1166_v18 }
 0x1d3   : > { %1184 = vadd.xlane.f32.xlu0 %v1183_v20  ;;  %v1186_v22 = vadd.f32 %v1182_v21, %v1181_v19 }
 0x1d7   : > { %1187 = vadd.xlane.f32.xlu0 %v1186_v22 }
 0x260   : > { %v1185_v24 = vpop.xlane.xlu0 %1184 }
 0x261   : > { %v1196_v25 = vadd.f32 %v1421_v23, %v1185_v24 }
 0x263   : > { %1199 = vst.msk [vmem:[%s329_s20] sm:$0xff] %vm1198_vm5, %v1196_v25 }
 0x264   : > { %v1188_v26 = vpop.xlane.xlu0 %1187 }
 0x265   : > { %v1197_v27 = vadd.f32 %v1421_v23, %v1188_v26 }
 0x267   : > { %1200 = vst.msk [vmem:[%s329_s20 + $0x8] sm:$0xff] %vm1198_vm5, %v1197_v27 }
 0x268 PF: > { %p19_p13 = scmp.ge.s32.totalorder %s1865_s4, 4   ;;  %s2082_s23 = smov %s1786_s24 }
 0x269   : > { %s2083_s24 = smov %s1790_s25  ;;  %s2084_s25 = smov %s1875_s29 }
 0x26a   : > { %s2085_s26 = smov %s1865_s4  ;;  %21 = sbr.rel (!%p19_p13) target bundleno = 7 (0x7), region = 99 }
 0x271   :  { %1223 = vsyncpa [#allocation4], 1 }
 0x272   :  { %1225 = vsyncpa [#allocation4 + $0x1], 1 }
 0x273   :  { %1226 = vsyncpa [#allocation6], 1 }

</bundles_post_ra>
